<compile_context>
chip_gen: v6e
topology: v6e:2x2x1
jax: 0.10.0
libtpu: 0.0.40
codegen_flags: <defaults>
</compile_context>

<pallas_src>
import functools

import jax
import jax.numpy as jnp
from jax.experimental import pallas as pl
from jax.experimental.pallas import tpu as pltpu

_LANE = 128
_SUB = 8


def _round_up(x: int, m: int) -> int:
    return (x + m - 1) // m * m


def _cat_linear_kernel(numbers_ref, gidx_ref, wt_ref, cat_params_ref,
                       bias_ref, out_ref, *, n_cat):
    tb = numbers_ref.shape[0]
    tpad = cat_params_ref.shape[0]

    # Numeric contribution on the MXU: [tb, Npad] @ [Npad, Opad] -> [tb, Opad]
    acc = jnp.dot(numbers_ref[...], wt_ref[...],
                  preferred_element_type=jnp.float32)
    acc = acc + bias_ref[...]                       # [1, Opad] broadcast

    # Categorical contribution: build a per-row count vector over the global
    # table index (sum of C one-hots; disjoint segments, so counts are 0/1 for
    # in-range inputs) and contract it against the whole table in ONE dot.
    iota = jax.lax.broadcasted_iota(jnp.int32, (tb, tpad), 1)   # [tb, Tpad]
    counts = (iota == gidx_ref[:, 0:1]).astype(jnp.float32)
    for c in range(1, n_cat):                       # small static unroll (VPU)
        counts = counts + (iota == gidx_ref[:, c:c + 1]).astype(jnp.float32)
    acc = acc + jnp.dot(counts, cat_params_ref[...],
                        preferred_element_type=jnp.float32)

    out_ref[...] = acc


def cat_linear(numbers, categories, weight, cat_params, bias, embed_sizes,
               *, block_b: int = 256):
    """Forward pass of CatLinear.  Glue (padding / transpose / index offsets)
    in plain JAX, hot loop in Pallas."""
    # TODO(synk): handle the numbers-only / categories-only variants of the
    # PyTorch module (optional inputs); this path assumes both are present.
    numbers = jnp.asarray(numbers, jnp.float32)
    categories = jnp.asarray(categories, jnp.int32)
    weight = jnp.asarray(weight, jnp.float32)
    cat_params = jnp.asarray(cat_params, jnp.float32)
    bias = jnp.asarray(bias, jnp.float32)

    B, N = numbers.shape
    O = weight.shape[0]
    C = len(embed_sizes)
    T = sum(int(e) for e in embed_sizes)
    assert categories.shape == (B, C)
    assert cat_params.shape == (T, O)

    # ---- lane / MXU friendly padding --------------------------------------
    Npad = max(_LANE, _round_up(N, _LANE))     # numeric contraction width
    Opad = max(_LANE, _round_up(O, _LANE))     # lane-dense output stores
    Tpad = max(_LANE, _round_up(T, _LANE))     # categorical contraction width

    # Batch tiling: tb rows per grid step (multiple of 8 sublanes).
    tb = _round_up(min(block_b, _round_up(B, _SUB)), _SUB)
    Bpad = _round_up(B, tb)
    grid = (Bpad // tb,)

    # Per-feature offsets into the flat table (PyTorch's embed_idx).
    es = jnp.asarray(embed_sizes, jnp.int32)
    embed_idx = jnp.cumsum(es) - es                           # [C]
    gidx = categories + embed_idx[None, :]                    # [B, C] global

    numbers_p = jnp.zeros((Bpad, Npad), jnp.float32).at[:B, :N].set(numbers)
    gidx_p = jnp.zeros((Bpad, C), jnp.int32).at[:B, :].set(gidx)
    wt_p = jnp.zeros((Npad, Opad), jnp.float32).at[:N, :O].set(weight.T)
    bias_p = jnp.zeros((1, Opad), jnp.float32).at[0, :O].set(bias)
    cat_params_p = jnp.zeros((Tpad, Opad), jnp.float32).at[:T, :O].set(cat_params)

    kernel = functools.partial(_cat_linear_kernel, n_cat=C)

    grid_spec = pltpu.PrefetchScalarGridSpec(
        num_scalar_prefetch=0,
        grid=grid,
        in_specs=[
            pl.BlockSpec((tb, Npad), lambda i: (i, 0)),     # numbers tile
            pl.BlockSpec((tb, C), lambda i: (i, 0)),        # global cat idx
            pl.BlockSpec((Npad, Opad), lambda i: (0, 0)),   # W^T   (resident)
            pl.BlockSpec((Tpad, Opad), lambda i: (0, 0)),   # table (resident)
            pl.BlockSpec((1, Opad), lambda i: (0, 0)),      # bias  (resident)
        ],
        out_specs=pl.BlockSpec((tb, Opad), lambda i: (i, 0)),
    )

    out_p = pl.pallas_call(
        kernel,
        out_shape=jax.ShapeDtypeStruct((Bpad, Opad), jnp.float32),
        grid_spec=grid_spec,
        compiler_params=pltpu.CompilerParams(
            dimension_semantics=("parallel",),
            vmem_limit_bytes=32 * 1024 * 1024,
        ),
    )(numbers_p, gidx_p, wt_p, cat_params_p, bias_p)

    return out_p[:B, :O]


if __name__ == "__main__":
    # Small shapes consistent with the module's forward.
    B = 300                       # exercises batch tiling + row padding
    numeric_size = 16
    embed_sizes = (4, 5, 6)
    output_size = 4
    n_cat = len(embed_sizes)
    total_embed = sum(embed_sizes)

    key = jax.random.PRNGKey(0)
    k_num, k_cat, k_w, k_e, k_b = jax.random.split(key, 5)

    numbers = jax.random.normal(k_num, (B, numeric_size), jnp.float32)
    cat_cols = [
        jax.random.randint(jax.random.fold_in(k_cat, i), (B, 1), 0, es)
        for i, es in enumerate(embed_sizes)
    ]
    categories = jnp.concatenate(cat_cols, axis=1).astype(jnp.int32)  # [B, C]

    # Module initializes params to zero; use non-trivial values so the
    # compute paths are actually exercised.
    weight = 0.1 * jax.random.normal(k_w, (output_size, numeric_size), jnp.float32)
    cat_params = 0.1 * jax.random.normal(k_e, (total_embed, output_size), jnp.float32)
    bias = 0.1 * jax.random.normal(k_b, (output_size,), jnp.float32)

    out = cat_linear(numbers, categories, weight, cat_params, bias,
                     embed_sizes, block_b=128)
    out = jax.block_until_ready(out)

    # Plain-JAX reference of the PyTorch forward.
    es = jnp.asarray(embed_sizes, jnp.int32)
    embed_idx = jnp.cumsum(es) - es
    gathered = cat_params[categories + embed_idx[None, :]]   # [B, C, O]
    ref = bias[None, :] + numbers @ weight.T + gathered.sum(axis=1)

    assert out.shape == (B, output_size)
    assert jnp.allclose(out, ref, atol=1e-5, rtol=1e-5), (
        float(jnp.max(jnp.abs(out - ref))))
    print("KERNEL_OK")
</pallas_src>

<mosaic_0001>
module attributes {stable_mosaic.version = 11 : i64} {
  func.func @_cat_linear_kernel(%arg0: i32, %arg1: memref<128x128xf32, #tpu.memory_space<vmem>>, %arg2: memref<128x3xi32, #tpu.memory_space<vmem>>, %arg3: memref<128x128xf32, #tpu.memory_space<vmem>>, %arg4: memref<128x128xf32, #tpu.memory_space<vmem>>, %arg5: memref<1x128xf32, #tpu.memory_space<vmem>>, %arg6: memref<128x128xf32, #tpu.memory_space<vmem>>) attributes {dimension_semantics = [#tpu.dimension_semantics<parallel>], iteration_bounds = array<i64: 3>, scalar_prefetch = 0 : i64, scratch_operands = 0 : i64, tpu.core_type = #tpu.core_type<tc>, window_params = [{transform_indices = @transform_0, window_bounds = array<i64: 128, 128>}, {transform_indices = @transform_1, window_bounds = array<i64: 128, 3>}, {pipeline_mode = #tpu.pipeline_mode<synchronous>, transform_indices = @transform_2, window_bounds = array<i64: 128, 128>}, {pipeline_mode = #tpu.pipeline_mode<synchronous>, transform_indices = @transform_3, window_bounds = array<i64: 128, 128>}, {pipeline_mode = #tpu.pipeline_mode<synchronous>, transform_indices = @transform_4, window_bounds = array<i64: 1, 128>}, {transform_indices = @transform_5, window_bounds = array<i64: 128, 128>}]} {
    %c0 = arith.constant 0 : index
    %c0_0 = arith.constant 0 : index
    %0 = vector.load %arg1[%c0, %c0_0] : memref<128x128xf32, #tpu.memory_space<vmem>>, vector<128x128xf32>
    %c0_1 = arith.constant 0 : index
    %c0_2 = arith.constant 0 : index
    %1 = vector.load %arg3[%c0_1, %c0_2] : memref<128x128xf32, #tpu.memory_space<vmem>>, vector<128x128xf32>
    %cst = arith.constant dense<0.000000e+00> : vector<128x128xf32>
    %2 = tpu.matmul %0, %1, %cst {dimension_numbers = #tpu.dot_dimension_numbers<[1], [0], [0], [1], [0, 0, 1, 1], [], []>} : vector<128x128xf32>, vector<128x128xf32>, vector<128x128xf32> -> vector<128x128xf32>
    %c0_3 = arith.constant 0 : index
    %c0_4 = arith.constant 0 : index
    %3 = vector.load %arg5[%c0_3, %c0_4] : memref<1x128xf32, #tpu.memory_space<vmem>>, vector<1x128xf32>
    %4 = vector.broadcast %3 : vector<1x128xf32> to vector<128x128xf32>
    %5 = arith.addf %2, %4 : vector<128x128xf32>
    %6 = tpu.iota {dimensions = array<i32: 1>} : vector<128x128xi32>
    %c0_5 = arith.constant 0 : index
    %c0_6 = arith.constant 0 : index
    %7 = vector.load %arg2[%c0_5, %c0_6] : memref<128x3xi32, #tpu.memory_space<vmem>>, vector<128x1xi32>
    %8 = vector.broadcast %7 : vector<128x1xi32> to vector<128x128xi32>
    %9 = arith.cmpi eq, %6, %8 : vector<128x128xi32>
    %10 = arith.extui %9 : vector<128x128xi1> to vector<128x128xi32>
    %11 = arith.sitofp %10 : vector<128x128xi32> to vector<128x128xf32>
    %c0_7 = arith.constant 0 : index
    %c1 = arith.constant 1 : index
    %12 = vector.load %arg2[%c0_7, %c1] : memref<128x3xi32, #tpu.memory_space<vmem>>, vector<128x1xi32>
    %13 = vector.broadcast %12 : vector<128x1xi32> to vector<128x128xi32>
    %14 = arith.cmpi eq, %6, %13 : vector<128x128xi32>
    %15 = arith.extui %14 : vector<128x128xi1> to vector<128x128xi32>
    %16 = arith.sitofp %15 : vector<128x128xi32> to vector<128x128xf32>
    %17 = arith.addf %11, %16 : vector<128x128xf32>
    %c0_8 = arith.constant 0 : index
    %c2 = arith.constant 2 : index
    %18 = vector.load %arg2[%c0_8, %c2] : memref<128x3xi32, #tpu.memory_space<vmem>>, vector<128x1xi32>
    %19 = vector.broadcast %18 : vector<128x1xi32> to vector<128x128xi32>
    %20 = arith.cmpi eq, %6, %19 : vector<128x128xi32>
    %21 = arith.extui %20 : vector<128x128xi1> to vector<128x128xi32>
    %22 = arith.sitofp %21 : vector<128x128xi32> to vector<128x128xf32>
    %23 = arith.addf %17, %22 : vector<128x128xf32>
    %c0_9 = arith.constant 0 : index
    %c0_10 = arith.constant 0 : index
    %24 = vector.load %arg4[%c0_9, %c0_10] : memref<128x128xf32, #tpu.memory_space<vmem>>, vector<128x128xf32>
    %cst_11 = arith.constant dense<0.000000e+00> : vector<128x128xf32>
    %25 = tpu.matmul %23, %24, %cst_11 {dimension_numbers = #tpu.dot_dimension_numbers<[1], [0], [0], [1], [0, 0, 1, 1], [], []>} : vector<128x128xf32>, vector<128x128xf32>, vector<128x128xf32> -> vector<128x128xf32>
    %26 = arith.addf %5, %25 : vector<128x128xf32>
    %c0_12 = arith.constant 0 : index
    %c0_13 = arith.constant 0 : index
    %27 = vector.load %arg6[%c0_12, %c0_13] : memref<128x128xf32, #tpu.memory_space<vmem>>, vector<128x128xf32>
    tpu.vector_store %arg6[%c0_12, %c0_13], %26 {strides = array<i32>} : memref<128x128xf32, #tpu.memory_space<vmem>>, vector<128x128xf32>,
    return
  }
  func.func @transform_0(%arg0: i32) -> (i32, i32) {
    %c0_i32 = arith.constant 0 : i32
    %c0_i32_0 = arith.constant 0 : i32
    return %arg0, %c0_i32 : i32, i32
  }
  func.func @transform_1(%arg0: i32) -> (i32, i32) {
    %c0_i32 = arith.constant 0 : i32
    %c0_i32_0 = arith.constant 0 : i32
    return %arg0, %c0_i32 : i32, i32
  }
  func.func @transform_2(%arg0: i32) -> (i32, i32) {
    %c0_i32 = arith.constant 0 : i32
    %c0_i32_0 = arith.constant 0 : i32
    %c0_i32_1 = arith.constant 0 : i32
    return %c0_i32, %c0_i32_0 : i32, i32
  }
  func.func @transform_3(%arg0: i32) -> (i32, i32) {
    %c0_i32 = arith.constant 0 : i32
    %c0_i32_0 = arith.constant 0 : i32
    %c0_i32_1 = arith.constant 0 : i32
    return %c0_i32, %c0_i32_0 : i32, i32
  }
  func.func @transform_4(%arg0: i32) -> (i32, i32) {
    %c0_i32 = arith.constant 0 : i32
    %c0_i32_0 = arith.constant 0 : i32
    %c0_i32_1 = arith.constant 0 : i32
    return %c0_i32, %c0_i32_0 : i32, i32
  }
  func.func @transform_5(%arg0: i32) -> (i32, i32) {
    %c0_i32 = arith.constant 0 : i32
    %c0_i32_0 = arith.constant 0 : i32
    return %arg0, %c0_i32 : i32, i32
  }
}

</mosaic_0001>

<bundles_post_ra>
// kernel: tpu_custom_call.1
= control target key start
LH: loop header
LB: loop body
LE: loop exit
PB: predicated region body
PF: predicated region fallthrough
CT: control target
= control target key end

     0   :  { %10 = vsyncpa [#allocation3], 0  ;;  %s2019_s0 = inlined_call_operand.vmem [shape: f32[384,128], index: 0, kind: input, shape index: {}]   ;;  %s2020_s1 = inlined_call_operand.vmem [shape: s32[384,3], index: 1, kind: input, shape index: {}]   ;;  %s2021_s2 = inlined_call_operand.hbm [shape: f32[128,128], index: 2, kind: input, shape index: {}]   ;;  %s2022_s3 = inlined_call_operand.hbm [shape: f32[128,128], index: 3, kind: input, shape index: {}]   ;;  %s2023_s4 = inlined_call_operand.vmem [shape: f32[1,128], index: 4, kind: input, shape index: {}]   ;;  %s2024_s5 = inlined_call_operand.hbm [shape: f32[384,128], index: 5, kind: output, shape index: {}]  }
   0x1   :  { %11 = vsyncpa [#allocation6], 0 }
   0x2   :  { %12 = vsyncpa [#allocation4], 0 }
   0x3   :  { %14 = vsyncpa [#allocation4 + $0x1], 0  ;;  %s1606_s18 = smov 0   ;;  %s1608_s19 = smov 0  }
   0x4   :  { %s1610_s20 = smov 0   ;;  %s1612_s21 = smov 0  }
   0x5 LB: > { %s1627_s22 = sadd.s32 4294967295, %s1563_s21   ;;  %s1103_s23 = sadd.s32 4294967294, %s1563_s21   ;;  %s1563_s21 = sphi %s1612_s21, %s2038_s21   ;;  %s1559_s20 = sphi %s1610_s20, %s2037_s20   ;;  %s1555_s19 = sphi %s1608_s19, %s2036_s19   ;;  %s1551_s18 = sphi %s1606_s18, %s2035_s18  }
   0x6   : > { %s1631_s24 = sadd.s32 1, %s1563_s21   ;;  %s142_s25 = sadd.s32 1, %s1559_s20 }
   0x7   : > { %s139_s26 = ssub.s32 %s1563_s21, %s1631_s24  ;;  %p152_p0 = scmp.ne.s32.totalorder %s1559_s20, %s1555_s19 }
   0x8   : > { %p140_p1 = scmp.eq.s32.totalorder %s139_s26, 0  ;;  %p153_p2 = scmp.eq.s32.totalorder %s1627_s22, 2 }
   0x9   : > { %p158_p3 = scmp.ne.s32.totalorder %s1555_s19, %s1551_s18  ;;  %p159_p4 = scmp.eq.s32.totalorder %s1103_s23, 2 }
   0xa   : > { %s1642_s27 = scalar_select %p140_p1, %s1559_s20, %s142_s25  }
   0xb   : > { %p1644_p5 = por %p153_p2, %p152_p0  ;;  %p1648_p6 = por %p159_p4, %p158_p3 }
   0xc   : > { %p1104_p7 = scmp.ge.s32.totalorder %s1563_s21, 1  ;;  %p166_p8 = scmp.lt.s32.totalorder %s1563_s21, 4 }
   0xd   : > { %s2027_s29 = scalar_select %p1648_p6, 1, 0 }
   0xe   : > { %p2025_p9 = scmp.eq.s32.totalorder %s1627_s22, 0  ;;  %p1655_p10 = pnand %p1104_p7, %p166_p8 }
   0xf   : > { %s1565_s6 = smov [#allocation2]   ;;  %s1566_s9 = smov [#allocation5]  }
  0x10   : > { %s178_s7 = sshll.u32 %s1565_s6, 4  ;;  %p1357_p11 = pneg %p1655_p10  ;;  %s179_s7 = int_to_ptr.vmem [resolvable:$true] %s178_s7 }
  0x11   : > { %s191_s10 = sshll.u32 %s1566_s9, 4  ;;  %s1454_s11 = scalar_lea.vmem %s179_s7, 2048  ;;  %s192_s10 = int_to_ptr.vmem [resolvable:$true] %s191_s10 }
  0x12   : > { %p1663_p12 = pnand %p2025_p9, %p1357_p11  ;;  %p1455_p0 = scmp.ne.s32.totalorder %s179_s7, %s1454_s11 }
  0x13   : > { %p1462_p3 = scmp.lt.s32.totalorder %s179_s7, %s179_s7  ;;  %p1463_p4 = scmp.lt.s32.totalorder %s1454_s11, %s1454_s11 }
  0x14   : > { %p1445_p13 = pneg %p1663_p12 }
  0x15   : > { %p1464_p7 = por %p1463_p4, %p1462_p3 }
  0x16   : > { %p1457_p1 = pnand %p1455_p0, %p1445_p13 }
  0x18   : > { %p1458_p2 = pneg %p1457_p1 }
  0x1a   : > { %p1465_p8 = pnand %p1464_p7, %p1458_p2 }
  0x1c   : > { %1468 = shalt.err (!%p1465_p8)
}
  0x1d   : > { %s1567_s12 = smov 128   ;;  %s1568_s13 = smov 8  }
  0x1e   : > { %1360 = dma.hbm_to_vmem [thread:$0]  (!%p1663_p12), %s2021_s2, 2048, %s179_s7, [#allocation3], %s1567_s12, %s1567_s12, %s1568_s13  }
  0x1f   : > { %s1480_s16 = scalar_lea.vmem %s192_s10, 2048  ;;  %p1488_p9 = scmp.lt.s32.totalorder %s192_s10, %s192_s10 }
  0x20   : > { %p1481_p11 = scmp.ne.s32.totalorder %s192_s10, %s1480_s16  ;;  %p1489_p6 = scmp.lt.s32.totalorder %s1480_s16, %s1480_s16 }
  0x22   : > { %p1483_p0 = pnand %p1481_p11, %p1445_p13  ;;  %p1490_p3 = por %p1489_p6, %p1488_p9 }
  0x24   : > { %p1484_p1 = pneg %p1483_p0 }
  0x26   : > { %p1491_p2 = pnand %p1490_p3, %p1484_p1 }
  0x28   : > { %1494 = shalt.err (!%p1491_p2)
}
  0x29   : > { %1363 = dma.hbm_to_vmem [thread:$0]  (!%p1663_p12), %s2022_s3, 2048, %s192_s10, [#allocation6], %s1567_s12, %s1567_s12, %s1568_s13  }
  0x2a   : > { %228 = sbr.rel (%p1655_p10) target bundleno = 541 (0x21d), region = 40  ;;  %p2030_p4 = scmp.eq.s32.totalorder (!%p1655_p10), %s1627_s22, 0 }
  0x2f   : > { %1538 = dma.done.wait (%p2030_p4), [#allocation3], 2048   ;;  %p2031_p13 = pmov %p2030_p4 }
  0x30   : > { %p2032_p7 = pmov %p2030_p4 }
  0x31   : > { %1540 = vsyncadd (%p2031_p13), [#allocation3], 4294965248 }
  0x32   : > { %1542 = dma.done.wait (%p2032_p7), [#allocation6], 2048   ;;  %p2033_p6 = pmov %p2030_p4 }
  0x33   : > { %s1112_s25 = sshll.u32 %s1627_s22, 4  ;;  %v1569_v0 = vmov 0   ;;  %v1570_v3 = vmov 1   ;;  %v309_v4 = vld [vmem:[#allocation2 + $0x78] sm:$0xff]  ;;  %v308_v5 = vld [vmem:[#allocation2 + $0x70] sm:$0xff]  ;;  %v1571_v9 = vmov 2   ;;  %v462_v62 = vlaneseq }
  0x34   : > { %1544 = vsyncadd (%p2033_p6), [#allocation6], 4294965248  ;;  %1417 = vset.pattern.permute.xlu1 %v1569_v0  ;;  %1415 = vset.pattern.permute.xlu0 %v1569_v0  ;;  %p266_p9 = scmp.lt.s32.totalorder %s1112_s25, 47  ;;  %v815_v6 = vld [vmem:[#allocation5 + $0x78] sm:$0xff]  ;;  %v814_v8 = vld [vmem:[#allocation5 + $0x70] sm:$0xff]  ;;  %s262_s13 = sand.u32 1, %s1555_s19  }
  0x35   : > { %1235 = vmatprep.subr.mxu0 %v309_v4  ;;  %1291 = vmatprep.subr.mxu1 %v815_v6  ;;  %v307_v10 = vld [vmem:[#allocation2 + $0x68] sm:$0xff]  ;;  %v306_v14 = vld [vmem:[#allocation2 + $0x60] sm:$0xff]  ;;  %v305_v15 = vld [vmem:[#allocation2 + $0x58] sm:$0xff]  ;;  %s1111_s14 = sshll.u32 %s262_s13, 7  ;;  %s1170_s16 = sshll.u32 %s1627_s22, 11 }
  0x36   : > { %s2040_s25 = smov (!%p266_p9, %s1112_s25), 47  ;;  %1236 = vmatpush3.msra.mxu0 %v309_v4  ;;  %1292 = vmatpush3.msra.mxu1 %v815_v6  ;;  %v813_v11 = vld [vmem:[#allocation5 + $0x68] sm:$0xff]  ;;  %v812_v16 = vld [vmem:[#allocation5 + $0x60] sm:$0xff]  ;;  %v811_v18 = vld [vmem:[#allocation5 + $0x58] sm:$0xff]  ;;  %s1937_s15 = scalar_lea.vmem [#allocation7], %s1111_s14 }
  0x37   : > { %s1113_s26 = sshll.u32 %s2040_s25, 3  ;;  %1237 = vmatprep.subr.mxu0 %v308_v5  ;;  %1293 = vmatprep.subr.mxu1 %v814_v8  ;;  %v304_v19 = vld [vmem:[#allocation2 + $0x50] sm:$0xff]  ;;  %v303_v21 = vld [vmem:[#allocation2 + $0x48] sm:$0xff]  ;;  %v302_v25 = vld [vmem:[#allocation2 + $0x40] sm:$0xff]  ;;  %s1007_s17 = sshll.u32 %s1937_s15, 4  ;;  %s1973_s17 = int_to_ptr.vmem [resolvable:$true] %s1007_s17 }
  0x38   : > { %s1706_s7 = scalar_lea.vmem %s2020_s1, %s1113_s26  ;;  %1238 = vmatpush3.msra.mxu0 %v308_v5  ;;  %1294 = vmatpush3.msra.mxu1 %v814_v8  ;;  %v810_v22 = vld [vmem:[#allocation5 + $0x50] sm:$0xff]  ;;  %v809_v23 = vld [vmem:[#allocation5 + $0x48] sm:$0xff]  ;;  %v301_v26 = vld [vmem:[#allocation2 + $0x38] sm:$0xff]  ;;  %s1763_s10 = scalar_lea.vmem %s2019_s0, %s1113_s26  ;;  %v1806_v5 = vand.u32 127, %v462_v62 }
  0x39   : > { %v1709_v1 = vld [vmem:[%s1706_s7 + $0x8] sm:$0xff]  ;;  %v464_v2 = vld [vmem:[%s1706_s7] sm:$0xff]  ;;  %v1717_v7 = vld [vmem:[%s1706_s7 + $0x18] sm:$0xff]  ;;  %1239 = vmatprep.subr.mxu0 %v307_v10  ;;  %1295 = vmatprep.subr.mxu1 %v813_v11  ;;  %s1971_s26 = scalar_lea.hbm %s2024_s5, %s1170_s16  ;;  %s1979_s22 = scalar_lea.sflag [#allocation4], %s262_s13 }
  0x3a   : > { %484 = vperm.xlu1 %1417, %v1709_v1   ;;  %481 = vperm.xlu0 %1415, %v464_v2   ;;  %v1723_v12 = vld [vmem:[%s1706_s7 + $0x28] sm:$0xff]  ;;  %v466_v13 = vld [vmem:[%s1706_s7 + $0x10] sm:$0xff]  ;;  %v1729_v17 = vld [vmem:[%s1706_s7 + $0x38] sm:$0xff]  ;;  %s1495_s30 = scalar_lea.vmem %s1973_s17, 2048  ;;  %s1573_s6 = smov [#allocation7]  }
  0x3b   : > { %1240 = vmatpush3.msra.mxu0 %v307_v10  ;;  %1296 = vmatpush3.msra.mxu1 %v813_v11  ;;  %v1734_v20 = vld [vmem:[%s1706_s7 + $0x48] sm:$0xff]  ;;  %v1738_v24 = vld [vmem:[%s1706_s7 + $0x58] sm:$0xff]  ;;  %v808_v27 = vld [vmem:[#allocation5 + $0x40] sm:$0xff]  ;;  %v1572_v10 = vmov 0.0   ;;  %p1496_p10 = scmp.ne.s32.totalorder %s1973_s17, %s1495_s30 }
  0x3c   : > { %1241 = vmatprep.subr.mxu0 %v306_v14  ;;  %1297 = vmatprep.subr.mxu1 %v812_v16  ;;  %v1743_v28 = vld [vmem:[%s1706_s7 + $0x68] sm:$0xff]  ;;  %v807_v29 = vld [vmem:[#allocation5 + $0x38] sm:$0xff]  ;;  %v300_v30 = vld [vmem:[#allocation2 + $0x30] sm:$0xff] }
  0x3d   : > { %1242 = vmatpush3.msra.mxu0 %v306_v14  ;;  %1298 = vmatpush3.msra.mxu1 %v812_v16  ;;  %v468_v31 = vld [vmem:[%s1706_s7 + $0x20] sm:$0xff]  ;;  %v1749_v32 = vld [vmem:[%s1706_s7 + $0x78] sm:$0xff]  ;;  %v299_v33 = vld [vmem:[#allocation2 + $0x28] sm:$0xff]  ;;  %p1497_p12 = pnand %p1496_p10, %p1644_p5 }
  0x3e   : > { %1418 = vset.pattern.permute.xlu1 %v1570_v3  ;;  %1416 = vset.pattern.permute.xlu0 %v1570_v3  ;;  %v806_v34 = vld [vmem:[#allocation5 + $0x30] sm:$0xff]  ;;  %v298_v35 = vld [vmem:[#allocation2 + $0x20] sm:$0xff]  ;;  %v805_v36 = vld [vmem:[#allocation5 + $0x28] sm:$0xff] }
  0x3f   : > { %580 = vperm.xlu1 %1418, %v1709_v1   ;;  %577 = vperm.xlu0 %1416, %v464_v2   ;;  %v804_v37 = vld [vmem:[#allocation5 + $0x20] sm:$0xff]  ;;  %v297_v38 = vld [vmem:[#allocation2 + $0x18] sm:$0xff]  ;;  %v296_v39 = vld [vmem:[#allocation2 + $0x10] sm:$0xff]  ;;  %p1498_p8 = pneg %p1497_p12 }
  0x40   : > { %1243 = vmatprep.subr.mxu0 %v305_v15  ;;  %1299 = vmatprep.subr.mxu1 %v811_v18  ;;  %v803_v40 = vld [vmem:[#allocation5 + $0x18] sm:$0xff]  ;;  %v295_v41 = vld [vmem:[#allocation2 + $0x8] sm:$0xff]  ;;  %v802_v42 = vld [vmem:[#allocation5 + $0x10] sm:$0xff] }
  0x41   : > { %1244 = vmatpush3.msra.mxu0 %v305_v15  ;;  %1300 = vmatpush3.msra.mxu1 %v811_v18  ;;  %v801_v43 = vld [vmem:[#allocation5 + $0x8] sm:$0xff]  ;;  %v294_v44 = vld [vmem:[#allocation2] sm:$0xff]  ;;  %v470_v46 = vld [vmem:[%s1706_s7 + $0x30] sm:$0xff] }
  0x42   : > { %1245 = vmatprep.subr.mxu0 %v304_v19  ;;  %1301 = vmatprep.subr.mxu1 %v810_v22  ;;  %v278_v45 = vld [vmem:[%s1763_s10] sm:$0xff]  ;;  %v279_v47 = vld [vmem:[%s1763_s10 + $0x8] sm:$0xff]  ;;  %v280_v49 = vld [vmem:[%s1763_s10 + $0x10] sm:$0xff] }
  0x43   : > { %1419 = vset.pattern.permute.xlu1 %v1571_v9  ;;  %1422 = vset.pattern.permute.xlu0 %v1569_v0  ;;  %v800_v48 = vld [vmem:[#allocation5] sm:$0xff]  ;;  %v281_v50 = vld [vmem:[%s1763_s10 + $0x18] sm:$0xff]  ;;  %v283_v52 = vld [vmem:[%s1763_s10 + $0x28] sm:$0xff] }
  0x44   : > { %689 = vperm.xlu1 %1419, %v464_v2   ;;  %490 = vperm.xlu0 %1422, %v1717_v7   ;;  %v282_v51 = vld [vmem:[%s1763_s10 + $0x20] sm:$0xff]  ;;  %v284_v53 = vld [vmem:[%s1763_s10 + $0x30] sm:$0xff]  ;;  %v285_v54 = vld [vmem:[%s1763_s10 + $0x38] sm:$0xff] }
  0x45   : > { %1246 = vmatpush3.msra.mxu0 %v304_v19  ;;  %1302 = vmatpush3.msra.mxu1 %v810_v22  ;;  %v472_v55 = vld [vmem:[%s1706_s7 + $0x40] sm:$0xff]  ;;  %v287_v57 = vld [vmem:[%s1763_s10 + $0x48] sm:$0xff]  ;;  %v474_v58 = vld [vmem:[%s1706_s7 + $0x50] sm:$0xff] }
  0x46   : > { %1247 = vmatprep.subr.mxu0 %v303_v21  ;;  %1303 = vmatprep.subr.mxu1 %v809_v23  ;;  %v286_v56 = vld [vmem:[%s1763_s10 + $0x40] sm:$0xff]  ;;  %v288_v59 = vld [vmem:[%s1763_s10 + $0x50] sm:$0xff]  ;;  %v289_v60 = vld [vmem:[%s1763_s10 + $0x58] sm:$0xff] }
  0x47   : > { %1248 = vmatpush3.msra.mxu0 %v303_v21  ;;  %1304 = vmatpush3.msra.mxu1 %v809_v23  ;;  %v476_v61 = vld [vmem:[%s1706_s7 + $0x60] sm:$0xff]  ;;  %v478_v6 = vld [vmem:[%s1706_s7 + $0x70] sm:$0xff]  ;;  %s1499_s7 = sshll.u32 %s1573_s6, 4  ;;  %s1500_s7 = int_to_ptr.vmem [resolvable:$false] %s1499_s7 }
  0x48   : > { %1420 = vset.pattern.permute.xlu1 %v1569_v0  ;;  %496 = vperm.xlu0 %1422, %v1723_v12   ;;  %v290_v63 = vld [vmem:[%s1763_s10 + $0x60] sm:$0xff]  ;;  %v292_v19 = vld [vmem:[%s1763_s10 + $0x70] sm:$0xff]  ;;  %s1501_s8 = scalar_lea.vmem %s1500_s7, 4096  ;;  %p1502_p11 = scmp.lt.s32.totalorder %s1973_s17, %s1500_s7 }
  0x49   : > { %487 = vperm.xlu1 %1420, %v466_v13   ;;  %1249 = vmatprep.subr.mxu0 %v302_v25  ;;  %p1503_p0 = scmp.lt.s32.totalorder %s1501_s8, %s1495_s30 }
  0x4a   : > { %1250 = vmatpush3.msra.mxu0 %v302_v25  ;;  %1305 = vmatprep.subr.mxu1 %v808_v27 }
  0x4b   : > { %1251 = vmatprep.subr.mxu0 %v301_v26  ;;  %1306 = vmatpush3.msra.mxu1 %v808_v27  ;;  %p1504_p1 = por %p1503_p0, %p1502_p11 }
  0x4c   : > { %502 = vperm.xlu0 %1422, %v1729_v17   ;;  %1252 = vmatpush3.msra.mxu0 %v301_v26 }
  0x4d   : > { %1421 = vset.pattern.permute.xlu1 %v1570_v3  ;;  %1307 = vmatprep.subr.mxu1 %v807_v29  ;;  %p1505_p3 = pnand %p1504_p1, %p1498_p8 }
  0x4e   : > { %583 = vperm.xlu1 %1421, %v466_v13   ;;  %1253 = vmatprep.subr.mxu0 %v300_v30 }
  0x4f   : > { %1308 = vmatpush3.msra.mxu1 %v807_v29  ;;  %1254 = vmatpush3.msra.mxu0 %v300_v30 }
  0x50   : > { %508 = vperm.xlu0 %1422, %v1734_v20   ;;  %1255 = vmatprep.subr.mxu0 %v299_v33 }
  0x51   : > { %1309 = vmatprep.subr.mxu1 %v806_v34  ;;  %1256 = vmatpush3.msra.mxu0 %v299_v33 }
  0x52   : > { %586 = vperm.xlu1 %1421, %v1717_v7   ;;  %1310 = vmatpush3.msra.mxu1 %v806_v34 }
  0x53   : > { %1257 = vmatprep.subr.mxu0 %v298_v35  ;;  %1311 = vmatprep.subr.mxu1 %v805_v36 }
  0x54   : > { %514 = vperm.xlu0 %1422, %v1738_v24   ;;  %1258 = vmatpush3.msra.mxu0 %v298_v35 }
  0x55   : > { %1312 = vmatpush3.msra.mxu1 %v805_v36  ;;  %1259 = vmatprep.subr.mxu0 %v297_v38 }
  0x56   : > { %1423 = vset.pattern.permute.xlu1 %v1571_v9  ;;  %1313 = vmatprep.subr.mxu1 %v804_v37 }
  0x57   : > { %695 = vperm.xlu1 %1423, %v466_v13   ;;  %1314 = vmatpush3.msra.mxu1 %v804_v37 }
  0x58   : > { %520 = vperm.xlu0 %1422, %v1743_v28   ;;  %1260 = vmatpush3.msra.mxu0 %v297_v38 }
  0x59   : > { %1261 = vmatprep.subr.mxu0 %v296_v39  ;;  %1315 = vmatprep.subr.mxu1 %v803_v40 }
  0x5a   : > { %1262 = vmatpush3.msra.mxu0 %v296_v39  ;;  %1316 = vmatpush3.msra.mxu1 %v803_v40 }
  0x5b   : > { %1424 = vset.pattern.permute.xlu1 %v1569_v0  ;;  %1263 = vmatprep.subr.mxu0 %v295_v41 }
  0x5c   : > { %493 = vperm.xlu1 %1424, %v468_v31   ;;  %526 = vperm.xlu0 %1422, %v1749_v32  }
  0x5d   : > { %1317 = vmatprep.subr.mxu1 %v802_v42  ;;  %1264 = vmatpush3.msra.mxu0 %v295_v41 }
  0x5e   : > { %1318 = vmatpush3.msra.mxu1 %v802_v42  ;;  %1265 = vmatprep.subr.mxu0 %v294_v44 }
  0x5f   : > { %1319 = vmatprep.subr.mxu1 %v801_v43  ;;  %1267 = vmatprep.mubr.f32.mxu0 %v278_v45 }
  0x60   : > { %1425 = vset.pattern.permute.xlu1 %v1570_v3  ;;  %1441 = vset.pattern.permute.xlu0 %v1571_v9 }
  0x61   : > { %589 = vperm.xlu1 %1425, %v468_v31   ;;  %692 = vperm.xlu0 %1441, %v1709_v1   ;;  %v291_v1 = vld [vmem:[%s1763_s10 + $0x68] sm:$0xff] }
  0x62   : > { %1266 = vmatpush3.msra.mxu0 %v294_v44  ;;  %1320 = vmatpush3.msra.mxu1 %v801_v43 }
  0x63   : > { %1268 = vmatmul.mubr.f32.vlgmr.msra.gmra.mxu0 %v279_v47  ;;  %1321 = vmatprep.subr.mxu1 %v800_v48 }
  0x64   : > { %1270 = vmatprep.mubr.f32.mxu0 %v280_v49  ;;  %1322 = vmatpush3.msra.mxu1 %v800_v48 }
  0x65   : > { %592 = vperm.xlu1 %1425, %v1723_v12   ;;  %698 = vperm.xlu0 %1441, %v1717_v7  }
  0x67   : > { %1271 = vmatmul.mubr.f32.gmra.mxu0 %v281_v50 }
  0x68   : > { %1273 = vmatprep.mubr.f32.mxu0 %v282_v51 }
  0x69   : > { %1426 = vset.pattern.permute.xlu1 %v1571_v9  ;;  %704 = vperm.xlu0 %1441, %v1723_v12  }
  0x6a   : > { %701 = vperm.xlu1 %1426, %v468_v31  }
  0x6b   : > { %1274 = vmatmul.mubr.f32.gmra.mxu0 %v283_v52 }
  0x6c   : > { %1276 = vmatprep.mubr.f32.mxu0 %v284_v53 }
  0x6d   : > { %710 = vperm.xlu0 %1441, %v1729_v17  }
  0x6e   : > { %1427 = vset.pattern.permute.xlu1 %v1569_v0 }
  0x6f   : > { %499 = vperm.xlu1 %1427, %v470_v46   ;;  %1277 = vmatmul.mubr.f32.gmra.mxu0 %v285_v54 }
  0x70   : > { %1279 = vmatprep.mubr.f32.mxu0 %v286_v56 }
  0x71   : > { %716 = vperm.xlu0 %1441, %v1734_v20  }
  0x73   : > { %1428 = vset.pattern.permute.xlu1 %v1570_v3  ;;  %1280 = vmatmul.mubr.f32.gmra.mxu0 %v287_v57 }
  0x74   : > { %595 = vperm.xlu1 %1428, %v470_v46   ;;  %1282 = vmatprep.mubr.f32.mxu0 %v288_v59 }
  0x75   : > { %722 = vperm.xlu0 %1441, %v1738_v24  }
  0x77   : > { %1283 = vmatmul.mubr.f32.gmra.mxu0 %v289_v60 }
  0x78   : > { %598 = vperm.xlu1 %1428, %v1729_v17   ;;  %1285 = vmatprep.mubr.f32.mxu0 %v290_v63 }
  0x79   : > { %728 = vperm.xlu0 %1441, %v1743_v28  }
  0x7b   : > { %1286 = vmatmul.mubr.f32.gmra.mxu0 %v291_v1 }
  0x7c   : > { %1429 = vset.pattern.permute.xlu1 %v1571_v9  ;;  %1288 = vmatprep.mubr.f32.mxu0 %v292_v19 }
  0x7d   : > { %707 = vperm.xlu1 %1429, %v470_v46   ;;  %734 = vperm.xlu0 %1441, %v1749_v32  }
  0x81   : > { %1430 = vset.pattern.permute.xlu1 %v1569_v0 }
  0x82   : > { %505 = vperm.xlu1 %1430, %v472_v55  }
  0x86   : > { %1431 = vset.pattern.permute.xlu1 %v1570_v3 }
  0x87   : > { %601 = vperm.xlu1 %1431, %v472_v55  }
  0x8b   : > { %604 = vperm.xlu1 %1431, %v1734_v20   ;;  %v293_v20 = vld [vmem:[%s1763_s10 + $0x78] sm:$0xff] }
  0x8c   : > { %1289 = vmatmul.mubr.f32.gmra.mxu0 %v293_v20 }
  0x8f   : > { %1432 = vset.pattern.permute.xlu1 %v1571_v9 }
  0x90   : > { %713 = vperm.xlu1 %1432, %v472_v55  }
  0x94   : > { %1433 = vset.pattern.permute.xlu1 %v1569_v0 }
  0x95   : > { %511 = vperm.xlu1 %1433, %v474_v58  }
  0x99   : > { %1434 = vset.pattern.permute.xlu1 %v1570_v3 }
  0x9a   : > { %607 = vperm.xlu1 %1434, %v474_v58  }
  0x9e   : > { %610 = vperm.xlu1 %1434, %v1738_v24  }
  0xa2   : > { %1435 = vset.pattern.permute.xlu1 %v1571_v9 }
  0xa3   : > { %719 = vperm.xlu1 %1435, %v474_v58  }
  0xa7   : > { %1436 = vset.pattern.permute.xlu1 %v1569_v0 }
  0xa8   : > { %517 = vperm.xlu1 %1436, %v476_v61  }
  0xac   : > { %1437 = vset.pattern.permute.xlu1 %v1570_v3 }
  0xad   : > { %613 = vperm.xlu1 %1437, %v476_v61  }
  0xb1   : > { %616 = vperm.xlu1 %1437, %v1743_v28  }
  0xb5   : > { %v485_v2 = vpop.permute.xlu1 %484  ;;  %1438 = vset.pattern.permute.xlu1 %v1571_v9  ;;  %v482_v4 = vpop.permute.xlu0 %481 }
  0xb6   : > { %725 = vperm.xlu1 %1438, %v476_v61   ;;  %vm528_vm0 = vcmp.eq.s32.totalorder %v1806_v5, %v482_v4  ;;  %vm529_vm5 = vcmp.eq.s32.totalorder %v1806_v5, %v485_v2 }
  0xb7   : > { %v1117_v11 = vsel %vm528_vm0, 1.0, %v1572_v10  ;;  %v1118_v30 = vsel %vm529_vm5, 1.0, %v1572_v10 }
  0xba   : > { %v581_v7 = vpop.permute.xlu1 %580  ;;  %1439 = vset.pattern.permute.xlu1 %v1569_v0  ;;  %v578_v8 = vpop.permute.xlu0 %577 }
  0xbb   : > { %523 = vperm.xlu1 %1439, %v478_v6   ;;  %vm624_vm1 = vcmp.eq.s32.totalorder %v1806_v5, %v578_v8  ;;  %vm625_vm3 = vcmp.eq.s32.totalorder %v1806_v5, %v581_v7 }
  0xbc   : > { %v1133_v12 = vsel %vm624_vm1, 1.0, %v1572_v10 }
  0xbd   : > { %v672_v13 = vadd.f32 %v1133_v12, %v1117_v11 }
  0xbf   : > { %1440 = vset.pattern.permute.xlu1 %v1570_v3  ;;  %v690_v14 = vpop.permute.xlu1 %689  ;;  %v491_v15 = vpop.permute.xlu0 %490 }
  0xc0   : > { %vm736_vm2 = vcmp.eq.s32.totalorder %v1806_v5, %v690_v14  ;;  %619 = vperm.xlu1 %1440, %v478_v6   ;;  %vm531_vm8 = vcmp.eq.s32.totalorder %v1806_v5, %v491_v15 }
  0xc1   : > { %v1149_v0 = vsel %vm736_vm2, 1.0, %v1572_v10  ;;  %v1120_v36 = vsel %vm531_vm8, 1.0, %v1572_v10 }
  0xc2   : > { %v784_v16 = vadd.f32 %v1149_v0, %v672_v13 }
  0xc3   : > { %v497_v17 = vpop.permute.xlu0 %496 }
  0xc4   : > { %622 = vperm.xlu1 %1440, %v1749_v32   ;;  %v488_v18 = vpop.permute.xlu1 %487  ;;  %1323 = vmatprep.mubr.f32.mxu1 %v784_v16  ;;  %vm533_vm12 = vcmp.eq.s32.totalorder %v1806_v5, %v497_v17 }
  0xc5   : > { %vm530_vm6 = vcmp.eq.s32.totalorder %v1806_v5, %v488_v18  ;;  %v1122_v48 = vsel %vm533_vm12, 1.0, %v1572_v10 }
  0xc6   : > { %v1119_v34 = vsel %vm530_vm6, 1.0, %v1572_v10 }
  0xc7   : > { %v1820_v21 = vpop.permute.xlu0 %502 }
  0xc8   : > { %1442 = vset.pattern.permute.xlu1 %v1571_v9  ;;  %v1134_v9 = vsel %vm625_vm3, 1.0, %v1572_v10  ;;  %vm535_vm2 = vcmp.eq.s32.totalorder %v1806_v5, %v1820_v21 }
  0xc9   : > { %731 = vperm.xlu1 %1442, %v478_v6   ;;  %v584_v3 = vpop.permute.xlu1 %583  ;;  %v673_v33 = vadd.f32 %v1134_v9, %v1118_v30  ;;  %v1124_v63 = vsel %vm535_vm2, 1.0, %v1572_v10 }
  0xca   : > { %vm626_vm4 = vcmp.eq.s32.totalorder %v1806_v5, %v584_v3 }
  0xcb   : > { %v1823_v22 = vpop.permute.xlu0 %508  ;;  %v1135_v29 = vsel %vm626_vm4, 1.0, %v1572_v10 }
  0xcc   : > { %v674_v37 = vadd.f32 %v1135_v29, %v1119_v34  ;;  %vm537_vm8 = vcmp.eq.s32.totalorder %v1806_v5, %v1823_v22 }
  0xcd   : > { %v587_v23 = vpop.permute.xlu1 %586  ;;  %v1126_v18 = vsel %vm537_vm8, 1.0, %v1572_v10 }
  0xce   : > { %vm627_vm9 = vcmp.eq.s32.totalorder %v1806_v5, %v587_v23 }
  0xcf   : > { %v1825_v24 = vpop.permute.xlu0 %514  ;;  %v1136_v38 = vsel %vm627_vm9, 1.0, %v1572_v10 }
  0xd0   : > { %v675_v44 = vadd.f32 %v1136_v38, %v1120_v36 }
  0xd2   : > { %v696_v25 = vpop.permute.xlu1 %695 }
  0xd3   : > { %v1827_v26 = vpop.permute.xlu0 %520  ;;  %vm738_vm7 = vcmp.eq.s32.totalorder %v1806_v5, %v696_v25 }
  0xd4   : > { %v1151_v35 = vsel %vm738_vm7, 1.0, %v1572_v10 }
  0xd5   : > { %v786_v41 = vadd.f32 %v1151_v35, %v674_v37 }
  0xd7   : > { %v494_v27 = vpop.permute.xlu1 %493  ;;  %v1830_v28 = vpop.permute.xlu0 %526 }
  0xd8   : > { %vm532_vm15 = vcmp.eq.s32.totalorder %v1806_v5, %v494_v27 }
  0xd9   : > { %v1121_v51 = vsel %vm532_vm15, 1.0, %v1572_v10  ;;  %vm539_vm15 = vcmp.eq.s32.totalorder %v1806_v5, %v1825_v24 }
  0xda   : > { %v1128_v36 = vsel %vm539_vm15, 1.0, %v1572_v10 }
  0xdc   : > { %v590_v31 = vpop.permute.xlu1 %589  ;;  %v693_v32 = vpop.permute.xlu0 %692 }
  0xdd   : > { %vm737_vm10 = vcmp.eq.s32.totalorder %v1806_v5, %v693_v32  ;;  %vm628_vm11 = vcmp.eq.s32.totalorder %v1806_v5, %v590_v31 }
  0xde   : > { %v1150_v39 = vsel %vm737_vm10, 1.0, %v1572_v10  ;;  %v1137_v46 = vsel %vm628_vm11, 1.0, %v1572_v10 }
  0xdf   : > { %v785_v40 = vadd.f32 %v1150_v39, %v673_v33  ;;  %v676_v53 = vadd.f32 %v1137_v46, %v1121_v51 }
  0xe0   : > { %v593_v42 = vpop.permute.xlu1 %592  ;;  %v699_v43 = vpop.permute.xlu0 %698 }
  0xe1   : > { %vm629_vm13 = vcmp.eq.s32.totalorder %v1806_v5, %v593_v42  ;;  %vm739_vm14 = vcmp.eq.s32.totalorder %v1806_v5, %v699_v43  ;;  %1324 = vmatmul.mubr.f32.vlgmr.msra.gmra.mxu1 %v785_v40 }
  0xe2   : > { %v1152_v45 = vsel %vm739_vm14, 1.0, %v1572_v10  ;;  %1326 = vmatprep.mubr.f32.mxu1 %v786_v41  ;;  %v1138_v49 = vsel %vm629_vm13, 1.0, %v1572_v10 }
  0xe3   : > { %v787_v47 = vadd.f32 %v1152_v45, %v675_v44  ;;  %v677_v55 = vadd.f32 %v1138_v49, %v1122_v48 }
  0xe4   : > { %v705_v50 = vpop.permute.xlu0 %704 }
  0xe5   : > { %vm741_vm0 = vcmp.eq.s32.totalorder %v1806_v5, %v705_v50  ;;  %v702_v52 = vpop.permute.xlu1 %701  ;;  %1327 = vmatmul.mubr.f32.gmra.mxu1 %v787_v47 }
  0xe6   : > { %v1154_v54 = vsel %vm741_vm0, 1.0, %v1572_v10  ;;  %vm740_vm1 = vcmp.eq.s32.totalorder %v1806_v5, %v702_v52 }
  0xe7   : > { %v1153_v56 = vsel %vm740_vm1, 1.0, %v1572_v10  ;;  %v789_v58 = vadd.f32 %v1154_v54, %v677_v55 }
  0xe8   : > { %v788_v57 = vadd.f32 %v1153_v56, %v676_v53  ;;  %v711_v62 = vpop.permute.xlu0 %710 }
  0xe9   : > { %vm743_vm6 = vcmp.eq.s32.totalorder %v1806_v5, %v711_v62 }
  0xea   : > { %v500_v59 = vpop.permute.xlu1 %499  ;;  %1329 = vmatprep.mubr.f32.mxu1 %v788_v57  ;;  %v1156_v11 = vsel %vm743_vm6, 1.0, %v1572_v10 }
  0xeb   : > { %1330 = vmatmul.mubr.f32.gmra.mxu1 %v789_v58  ;;  %vm534_vm5 = vcmp.eq.s32.totalorder %v1806_v5, %v500_v59 }
  0xec   : > { %v1123_v4 = vsel %vm534_vm5, 1.0, %v1572_v10  ;;  %v717_v17 = vpop.permute.xlu0 %716  ;;  %vm541_vm5 = vcmp.eq.s32.totalorder %v1806_v5, %v1827_v26 }
  0xed   : > { %vm745_vm12 = vcmp.eq.s32.totalorder %v1806_v5, %v717_v17  ;;  %v1130_v49 = vsel %vm541_vm5, 1.0, %v1572_v10 }
  0xee   : > { %v1158_v25 = vsel %vm745_vm12, 1.0, %v1572_v10 }
  0xef   : > { %v596_v60 = vpop.permute.xlu1 %595 }
  0xf0   : > { %vm630_vm3 = vcmp.eq.s32.totalorder %v1806_v5, %v596_v60  ;;  %v723_v33 = vpop.permute.xlu0 %722 }
  0xf1   : > { %v1139_v2 = vsel %vm630_vm3, 1.0, %v1572_v10  ;;  %vm747_vm2 = vcmp.eq.s32.totalorder %v1806_v5, %v723_v33 }
  0xf2   : > { %v678_v8 = vadd.f32 %v1139_v2, %v1123_v4  ;;  %v1160_v41 = vsel %vm747_vm2, 1.0, %v1572_v10 }
  0xf3   : > { %v599_v61 = vpop.permute.xlu1 %598 }
  0xf4   : > { %vm631_vm4 = vcmp.eq.s32.totalorder %v1806_v5, %v599_v61  ;;  %v729_v50 = vpop.permute.xlu0 %728 }
  0xf5   : > { %v1140_v1 = vsel %vm631_vm4, 1.0, %v1572_v10  ;;  %vm749_vm8 = vcmp.eq.s32.totalorder %v1806_v5, %v729_v50 }
  0xf6   : > { %v679_v6 = vadd.f32 %v1140_v1, %v1124_v63  ;;  %v1162_v55 = vsel %vm749_vm8, 1.0, %v1572_v10 }
  0xf8   : > { %v708_v7 = vpop.permute.xlu1 %707  ;;  %v791_v14 = vadd.f32 %v1156_v11, %v679_v6  ;;  %v735_v61 = vpop.permute.xlu0 %734 }
  0xf9   : > { %vm742_vm7 = vcmp.eq.s32.totalorder %v1806_v5, %v708_v7 }
  0xfa   : > { %v1155_v12 = vsel %vm742_vm7, 1.0, %v1572_v10 }
  0xfb   : > { %v790_v13 = vadd.f32 %v1155_v12, %v678_v8 }
  0xfd   : > { %v506_v15 = vpop.permute.xlu1 %505  ;;  %1332 = vmatprep.mubr.f32.mxu1 %v790_v13 }
  0xfe   : > { %1333 = vmatmul.mubr.f32.gmra.mxu1 %v791_v14  ;;  %vm536_vm11 = vcmp.eq.s32.totalorder %v1806_v5, %v506_v15  ;;  %v1929_v15 = vld [vmem:[%s2023_s4] ss:$0 sm:$0xff] }
  0xff   : > { %v1125_v21 = vsel %vm536_vm11, 1.0, %v1572_v10  ;;  %vm543_vm11 = vcmp.eq.s32.totalorder %v1806_v5, %v1830_v28 }
 0x100   : > { %v1132_v1 = vsel %vm543_vm11, 1.0, %v1572_v10 }
 0x102   : > { %v602_v0 = vpop.permute.xlu1 %601 }
 0x103   : > { %vm632_vm9 = vcmp.eq.s32.totalorder %v1806_v5, %v602_v0 }
 0x104   : > { %v1141_v20 = vsel %vm632_vm9, 1.0, %v1572_v10 }
 0x105   : > { %v680_v23 = vadd.f32 %v1141_v20, %v1125_v21 }
 0x106   : > { %v605_v16 = vpop.permute.xlu1 %604 }
 0x107   : > { %vm633_vm10 = vcmp.eq.s32.totalorder %v1806_v5, %v605_v16 }
 0x108   : > { %v1142_v19 = vsel %vm633_vm10, 1.0, %v1572_v10 }
 0x109   : > { %v681_v3 = vadd.f32 %v1142_v19, %v1126_v18 }
 0x10b   : > { %v714_v22 = vpop.permute.xlu1 %713  ;;  %v793_v29 = vadd.f32 %v1158_v25, %v681_v3 }
 0x10c   : > { %vm744_vm13 = vcmp.eq.s32.totalorder %v1806_v5, %v714_v22 }
 0x10d   : > { %v1157_v27 = vsel %vm744_vm13, 1.0, %v1572_v10 }
 0x10e   : > { %v792_v9 = vadd.f32 %v1157_v27, %v680_v23 }
 0x110   : > { %v512_v30 = vpop.permute.xlu1 %511  ;;  %1335 = vmatprep.mubr.f32.mxu1 %v792_v9 }
 0x111   : > { %1336 = vmatmul.mubr.f32.gmra.mxu1 %v793_v29  ;;  %vm538_vm1 = vcmp.eq.s32.totalorder %v1806_v5, %v512_v30 }
 0x112   : > { %v1127_v37 = vsel %vm538_vm1, 1.0, %v1572_v10 }
 0x115   : > { %v608_v31 = vpop.permute.xlu1 %607 }
 0x116   : > { %vm634_vm14 = vcmp.eq.s32.totalorder %v1806_v5, %v608_v31 }
 0x117   : > { %v1143_v35 = vsel %vm634_vm14, 1.0, %v1572_v10  ;;  %vm751_vm14 = vcmp.eq.s32.totalorder %v1806_v5, %v735_v61 }
 0x118   : > { %v682_v40 = vadd.f32 %v1143_v35, %v1127_v37  ;;  %v1164_v8 = vsel %vm751_vm14, 1.0, %v1572_v10 }
 0x119   : > { %v611_v32 = vpop.permute.xlu1 %610 }
 0x11a   : > { %vm635_vm0 = vcmp.eq.s32.totalorder %v1806_v5, %v611_v32 }
 0x11b   : > { %v1144_v34 = vsel %vm635_vm0, 1.0, %v1572_v10 }
 0x11c   : > { %v683_v38 = vadd.f32 %v1144_v34, %v1128_v36 }
 0x11e   : > { %v720_v39 = vpop.permute.xlu1 %719  ;;  %v795_v43 = vadd.f32 %v1160_v41, %v683_v38 }
 0x11f   : > { %vm746_vm3 = vcmp.eq.s32.totalorder %v1806_v5, %v720_v39 }
 0x120   : > { %v1159_v24 = vsel %vm746_vm3, 1.0, %v1572_v10 }
 0x121   : > { %v794_v42 = vadd.f32 %v1159_v24, %v682_v40 }
 0x123   : > { %v518_v44 = vpop.permute.xlu1 %517  ;;  %1338 = vmatprep.mubr.f32.mxu1 %v794_v42  ;;  %v1269_v13 = vpop.f32.mrf.mxu0 }
 0x124   : > { %1339 = vmatmul.mubr.f32.gmra.mxu1 %v795_v43  ;;  %vm540_vm7 = vcmp.eq.s32.totalorder %v1806_v5, %v518_v44  ;;  %v389_v16 = vadd.f32 %v1269_v13, %v1929_v15 }
 0x125   : > { %v1129_v51 = vsel %vm540_vm7, 1.0, %v1572_v10  ;;  %v383_v14 = vpop.f32.mrf.mxu0 }
 0x127   : > { %v1272_v0 = vpop.f32.mrf.mxu0 }
 0x128   : > { %v614_v45 = vpop.permute.xlu1 %613  ;;  %v399_v19 = vadd.f32 %v1272_v0, %v1929_v15 }
 0x129   : > { %vm636_vm4 = vcmp.eq.s32.totalorder %v1806_v5, %v614_v45  ;;  %v393_v17 = vpop.f32.mrf.mxu0 }
 0x12a   : > { %v1145_v48 = vsel %vm636_vm4, 1.0, %v1572_v10  ;;  %v394_v22 = vadd.f32 %v1929_v15, %v393_v17 }
 0x12b   : > { %v684_v54 = vadd.f32 %v1145_v48, %v1129_v51  ;;  %v1275_v21 = vpop.f32.mrf.mxu0 }
 0x12c   : > { %v617_v46 = vpop.permute.xlu1 %616  ;;  %v409_v30 = vadd.f32 %v1275_v21, %v1929_v15 }
 0x12d   : > { %vm637_vm6 = vcmp.eq.s32.totalorder %v1806_v5, %v617_v46  ;;  %v403_v9 = vpop.f32.mrf.mxu0 }
 0x12e   : > { %v1146_v47 = vsel %vm637_vm6, 1.0, %v1572_v10  ;;  %v404_v31 = vadd.f32 %v1929_v15, %v403_v9 }
 0x12f   : > { %v685_v52 = vadd.f32 %v1146_v47, %v1130_v49  ;;  %v1278_v36 = vpop.f32.mrf.mxu0 }
 0x130   : > { %v419_v38 = vadd.f32 %v1278_v36, %v1929_v15 }
 0x131   : > { %v726_v53 = vpop.permute.xlu1 %725  ;;  %v797_v57 = vadd.f32 %v1162_v55, %v685_v52  ;;  %v413_v37 = vpop.f32.mrf.mxu0 }
 0x132   : > { %vm748_vm9 = vcmp.eq.s32.totalorder %v1806_v5, %v726_v53  ;;  %v414_v39 = vadd.f32 %v1929_v15, %v413_v37 }
 0x133   : > { %v1161_v26 = vsel %vm748_vm9, 1.0, %v1572_v10  ;;  %v1281_v43 = vpop.f32.mrf.mxu0 }
 0x134   : > { %v796_v56 = vadd.f32 %v1161_v26, %v684_v54  ;;  %v429_v45 = vadd.f32 %v1281_v43, %v1929_v15 }
 0x135   : > { %v423_v44 = vpop.f32.mrf.mxu0 }
 0x136   : > { %v524_v58 = vpop.permute.xlu1 %523  ;;  %1341 = vmatprep.mubr.f32.mxu1 %v796_v56  ;;  %v424_v46 = vadd.f32 %v1929_v15, %v423_v44 }
 0x137   : > { %1342 = vmatmul.mubr.f32.gmra.mxu1 %v797_v57  ;;  %vm542_vm13 = vcmp.eq.s32.totalorder %v1806_v5, %v524_v58  ;;  %v1284_v51 = vpop.f32.mrf.mxu0 }
 0x138   : > { %v1131_v2 = vsel %vm542_vm13, 1.0, %v1572_v10  ;;  %v439_v53 = vadd.f32 %v1284_v51, %v1929_v15 }
 0x139   : > { %v433_v52 = vpop.f32.mrf.mxu0 }
 0x13a   : > { %v434_v54 = vadd.f32 %v1929_v15, %v433_v52 }
 0x13b   : > { %v620_v59 = vpop.permute.xlu1 %619  ;;  %v1287_v58 = vpop.f32.mrf.mxu0 }
 0x13c   : > { %vm638_vm10 = vcmp.eq.s32.totalorder %v1806_v5, %v620_v59 }
 0x13d   : > { %v1147_v63 = vsel %vm638_vm10, 1.0, %v1572_v10  ;;  %v443_v59 = vpop.f32.mrf.mxu0 }
 0x13e   : > { %v686_v28 = vadd.f32 %v1147_v63, %v1131_v2  ;;  %v444_v61 = vadd.f32 %v1929_v15, %v443_v59 }
 0x13f   : > { %v623_v60 = vpop.permute.xlu1 %622 }
 0x140   : > { %vm639_vm12 = vcmp.eq.s32.totalorder %v1806_v5, %v623_v60  ;;  %v449_v60 = vadd.f32 %v1287_v58, %v1929_v15 }
 0x141   : > { %v1148_v62 = vsel %vm639_vm12, 1.0, %v1572_v10 }
 0x142   : > { %v687_v4 = vadd.f32 %v1148_v62, %v1132_v1 }
 0x144   : > { %v732_v6 = vpop.permute.xlu1 %731  ;;  %v799_v12 = vadd.f32 %v1164_v8, %v687_v4 }
 0x145   : > { %vm750_vm15 = vcmp.eq.s32.totalorder %v1806_v5, %v732_v6  ;;  %v384_v5 = vadd.f32 %v1929_v15, %v383_v14 }
 0x146   : > { %v1163_v7 = vsel %vm750_vm15, 1.0, %v1572_v10 }
 0x147   : > { %v798_v11 = vadd.f32 %v1163_v7, %v686_v28 }
 0x149   : > { %1344 = vmatprep.mubr.f32.mxu1 %v798_v11 }
 0x14a   : > { %1345 = vmatmul.mubr.f32.gmra.mxu1 %v799_v12 }
 0x14c   : > { %v1290_v4 = vpop.f32.mrf.mxu0 }
 0x14d   : > { %v459_v6 = vadd.f32 %v1290_v4, %v1929_v15 }
 0x14e   : > { %v453_v28 = vpop.f32.mrf.mxu0 }
 0x14f   : > { %v454_v8 = vadd.f32 %v1929_v15, %v453_v28 }
 0x1a1   : > { %v1325_v10 = vpop.f32.mrf.mxu1 }
 0x1a2   : > { %v962_v18 = vadd.f32 %v1325_v10, %v389_v16 }
 0x1a3   : > { %v882_v20 = vpop.f32.mrf.mxu1 }
 0x1a4   : > { %978 = vst [vmem:[%s1937_s15 + $0x8] sm:$0xff] %v962_v18  ;;  %v961_v3 = vadd.f32 %v882_v20, %v384_v5 }
 0x1a5   : > { %v1328_v23 = vpop.f32.mrf.mxu1 }
 0x1a6   : > { %977 = vst [vmem:[%s1937_s15] sm:$0xff] %v961_v3  ;;  %v964_v25 = vadd.f32 %v1328_v23, %v399_v19 }
 0x1a7   : > { %v892_v27 = vpop.f32.mrf.mxu1 }
 0x1a8   : > { %980 = vst [vmem:[%s1937_s15 + $0x18] sm:$0xff] %v964_v25  ;;  %v963_v29 = vadd.f32 %v892_v27, %v394_v22 }
 0x1aa   : > { %979 = vst [vmem:[%s1937_s15 + $0x10] sm:$0xff] %v963_v29 }
 0x1ab   : > { %v1331_v32 = vpop.f32.mrf.mxu1 }
 0x1ac   : > { %v966_v33 = vadd.f32 %v1331_v32, %v409_v30 }
 0x1ad   : > { %v902_v34 = vpop.f32.mrf.mxu1 }
 0x1ae   : > { %982 = vst [vmem:[%s1937_s15 + $0x28] sm:$0xff] %v966_v33  ;;  %v965_v35 = vadd.f32 %v902_v34, %v404_v31 }
 0x1b0   : > { %981 = vst [vmem:[%s1937_s15 + $0x20] sm:$0xff] %v965_v35 }
 0x1be   : > { %v1334_v40 = vpop.f32.mrf.mxu1 }
 0x1bf   : > { %v968_v41 = vadd.f32 %v1334_v40, %v419_v38 }
 0x1c0   : > { %v912_v24 = vpop.f32.mrf.mxu1 }
 0x1c1   : > { %984 = vst [vmem:[%s1937_s15 + $0x38] sm:$0xff] %v968_v41  ;;  %v967_v42 = vadd.f32 %v912_v24, %v414_v39 }
 0x1c3   : > { %983 = vst [vmem:[%s1937_s15 + $0x30] sm:$0xff] %v967_v42 }
 0x1d1   : > { %v1337_v47 = vpop.f32.mrf.mxu1 }
 0x1d2   : > { %v970_v48 = vadd.f32 %v1337_v47, %v429_v45 }
 0x1d3   : > { %v922_v49 = vpop.f32.mrf.mxu1 }
 0x1d4   : > { %986 = vst [vmem:[%s1937_s15 + $0x48] sm:$0xff] %v970_v48  ;;  %v969_v50 = vadd.f32 %v922_v49, %v424_v46 }
 0x1d6   : > { %985 = vst [vmem:[%s1937_s15 + $0x40] sm:$0xff] %v969_v50 }
 0x1e4   : > { %v1340_v26 = vpop.f32.mrf.mxu1 }
 0x1e5   : > { %v972_v55 = vadd.f32 %v1340_v26, %v439_v53 }
 0x1e6   : > { %v932_v56 = vpop.f32.mrf.mxu1 }
 0x1e7   : > { %988 = vst [vmem:[%s1937_s15 + $0x58] sm:$0xff] %v972_v55  ;;  %v971_v57 = vadd.f32 %v932_v56, %v434_v54 }
 0x1e9   : > { %987 = vst [vmem:[%s1937_s15 + $0x50] sm:$0xff] %v971_v57 }
 0x1f7   : > { %v1343_v62 = vpop.f32.mrf.mxu1 }
 0x1f8   : > { %v974_v63 = vadd.f32 %v1343_v62, %v449_v60 }
 0x1f9   : > { %v942_v1 = vpop.f32.mrf.mxu1 }
 0x1fa   : > { %990 = vst [vmem:[%s1937_s15 + $0x68] sm:$0xff] %v974_v63  ;;  %v973_v2 = vadd.f32 %v942_v1, %v444_v61 }
 0x1fc   : > { %989 = vst [vmem:[%s1937_s15 + $0x60] sm:$0xff] %v973_v2 }
 0x20a   : > { %v1346_v7 = vpop.f32.mrf.mxu1 }
 0x20b   : > { %v976_v11 = vadd.f32 %v1346_v7, %v459_v6 }
 0x20c   : > { %v952_v12 = vpop.f32.mrf.mxu1 }
 0x20d   : > { %992 = vst [vmem:[%s1937_s15 + $0x78] sm:$0xff] %v976_v11  ;;  %v975_v13 = vadd.f32 %v952_v12, %v454_v8 }
 0x20f   : > { %991 = vst [vmem:[%s1937_s15 + $0x70] sm:$0xff] %v975_v13 }
 0x210   : > { %1508 = shalt.err (!%p1505_p3)
}
 0x211   : > { %s1509_s9 = scalar_lea.hbm %s1971_s26, 2048  ;;  %s1513_s12 = scalar_lea.hbm %s2024_s5, 6144 }
 0x212   : > { %p1510_p2 = scmp.ne.s32.totalorder %s1971_s26, %s1509_s9  ;;  %p1514_p7 = scmp.lt.s32.totalorder %s1971_s26, %s2024_s5 }
 0x213   : > { %p1515_p6 = scmp.lt.s32.totalorder %s1513_s12, %s1509_s9 }
 0x214   : > { %p1511_p4 = pnand %p1510_p2, %p1644_p5 }
 0x215   : > { %p1516_p9 = por %p1515_p6, %p1514_p7 }
 0x216   : > { %p1512_p13 = pneg %p1511_p4 }
 0x218   : > { %p1517_p10 = pnand %p1516_p9, %p1512_p13 }
 0x21a   : > { %1520 = shalt.err (!%p1517_p10)
}
 0x21b   : > { %s1574_s15 = smov 128   ;;  %s1575_s16 = smov 8  }
 0x21c   : > { %1355 = dma.vmem_to_hbm [thread:$0]  (%p1644_p5), %s1973_s17, 2048, %s1971_s26, %s1979_s22, %s1574_s15, %s1574_s15, %s1575_s16  }
 0x21d PF: > { %p1372_p12 = scmp.ge.s32.totalorder %s1563_s21, 2  ;;  %s1022_s23 = sand.u32 1, %s1551_s18  }
 0x21e   : > { %p2034_p8 = scmp.ne.s32.totalorder %s2027_s29, 0  ;;  %s1023_s25 = scalar_lea.sflag [#allocation4], %s1022_s23 }
 0x220   : > { %p1365_p11 = pnand %p1372_p12, %p2034_p8 }
 0x222   : > { %p1366_p0 = pneg %p1365_p11 }
 0x224   : > { %1546 = dma.done.wait (%p1366_p0), %s1023_s25, 2048  }
 0x225   : > { %1548 = vsyncadd (%p1366_p0), %s1023_s25, 4294965248  ;;  %p17_p1 = scmp.ge.s32.totalorder %s1631_s24, 5   ;;  %s2035_s18 = smov %s1555_s19 }
 0x226   : > { %s2036_s19 = smov %s1559_s20  ;;  %s2037_s20 = smov %s1642_s27 }
 0x227   : > { %s2038_s21 = smov %s1631_s24  ;;  %19 = sbr.rel (!%p17_p1) target bundleno = 5 (0x5), region = 87 }
 0x22c   :  { %1028 = vsyncpa [#allocation3], 1 }
 0x22d   :  { %1030 = vsyncpa [#allocation3 + $0x1], 1 }
 0x22e   :  { %1031 = vsyncpa [#allocation6], 1 }
 0x22f   :  { %1032 = vsyncpa [#allocation4], 1 }
 0x230   :  { %1034 = vsyncpa [#allocation4 + $0x1], 1 }

</bundles_post_ra>
